<compile_context>
chip_gen: v7x
topology: tpu7x:2x2x1
jax: 0.10.0
libtpu: 0.0.40
codegen_flags: <defaults>
</compile_context>

<pallas_src>
import functools

import jax
import jax.numpy as jnp
from jax.experimental import pallas as pl
from jax.experimental.pallas import tpu as pltpu

EOS = 1e-10


def _round_up(x, m):
    return ((x + m - 1) // m) * m


def _pad2(x, shape):
    return jnp.pad(x, ((0, shape[0] - x.shape[0]), (0, shape[1] - x.shape[1])))


def _device_tuning():
    """(square adjacency tile cap, vmem_limit_bytes) per TPU generation."""
    cap, vmem = 512, 40 * 1024 * 1024            # v7x / unknown: 64 MiB phys VMEM
    try:
        kind = jax.devices()[0].device_kind.lower()
    except Exception:
        kind = ""
    if ("v5" in kind) or ("v6" in kind):         # 128 MiB VMEM generations
        cap, vmem = 1024, 64 * 1024 * 1024
    return cap, vmem


def _adj_tiling(n, cap):
    """Pad n to a multiple of 128; pick the largest tile <= cap that divides it."""
    n_pad = _round_up(max(n, 1), 128)
    if n_pad <= cap:
        return n_pad, n_pad
    tile, t = 128, 128
    while t <= cap:
        if n_pad % t == 0:
            tile = t
        t += 128
    return n_pad, tile


# ----------------------------- Pallas kernels ------------------------------ #

def node_score_kernel(x_ref, w1_ref, b1_ref, wsum_ref, s_ref):
    # s = relu(x @ W1 + b1) @ (w2_a + w2_b)   (per-node scalar score)
    h = jnp.dot(x_ref[...], w1_ref[...], preferred_element_type=jnp.float32)
    h = jnp.maximum(h + b1_ref[...], 0.0)
    s_ref[...] = jnp.dot(h, wsum_ref[...], preferred_element_type=jnp.float32)


def edge_gate_kernel(su_ref, sv_ref, noise_ref, lp_ref, *, inv_temp):
    # lp = sigmoid((0.5*(s_u + s_v) + gumbel_noise) / T); edges on the lane axis.
    raw = 0.5 * (su_ref[...] + sv_ref[...])
    lp_ref[...] = jax.nn.sigmoid((raw + noise_ref[...]) * inv_temp)


def scatter_degree_kernel(starts_ref, u_ref, v_ref, w_ref,
                          adj_ref, mask_ref, inv_lp_ref, inv_hp_ref,
                          mask_f32):
    # Dense scatter of the edge weights into one row tile of the adjacency plus
    # fused row-degree -> D^{-1/2} computation.  Edges are pre-sorted by row and
    # bucketed per row tile (starts); indices/weights live in SMEM.
    i = pl.program_id(0)
    tm, npad = adj_ref.shape
    adj_ref[...] = jnp.zeros_like(adj_ref)
    mask_f32[...] = jnp.zeros_like(mask_f32)
    lane = jax.lax.broadcasted_iota(jnp.int32, (1, npad), 1)
    row0 = i * tm

    def body(e, carry):
        u = u_ref[e] - row0
        v = v_ref[e]
        w = w_ref[e]
        hit = lane == v
        # TODO(synk): for very large graphs switch this full-row RMW to an
        # aligned (8,128) blocklet update to cut per-edge VMEM traffic.
        arow = adj_ref[pl.ds(u, 1), :]
        adj_ref[pl.ds(u, 1), :] = jnp.where(hit, w, arow)
        mrow = mask_f32[pl.ds(u, 1), :]
        mask_f32[pl.ds(u, 1), :] = jnp.where(hit, 1.0, mrow)
        return carry

    jax.lax.fori_loop(starts_ref[i], starts_ref[i + 1], body, 0)

    # Degrees from the materialized tile (exact under .set() semantics).
    deg_lp = jnp.sum(adj_ref[...], axis=1, keepdims=True) + 1.0      # + self loop
    deg_m = jnp.sum(mask_f32[...], axis=1, keepdims=True)
    deg_hp = (deg_m - (deg_lp - 1.0)) + 1.0                          # hp adj = mask - lp
    # GREET normalize_adj: 1 / (sqrt(rowsum) + EOS)
    inv_lp_ref[...] = 1.0 / (jnp.sqrt(deg_lp) + EOS)
    inv_hp_ref[...] = 1.0 / (jnp.sqrt(deg_hp) + EOS)
    mask_ref[...] = mask_f32[...].astype(jnp.int8)                   # int8 mask


def adj_norm_kernel(adj_ref, mask_ref, il_r_ref, il_c_ref, ih_r_ref, ih_c_ref,
                    lp_ref, hp_ref, *, alpha):
    # Elementwise: lp = inv_r*(A+I)*inv_c ; hp = I - inv_r*((M-A)+I)*inv_c * M * alpha
    a = adj_ref[...]
    m = mask_ref[...].astype(jnp.float32)
    il_r, il_c = il_r_ref[...], il_c_ref[...]
    ih_r, ih_c = ih_r_ref[...], ih_c_ref[...]

    # Off-diagonal tiles: the identity never intersects, skip the iota/eye math.
    lp_ref[...] = il_r * a * il_c
    hp_ref[...] = -(ih_r * (m - a) * ih_c) * m * alpha

    @pl.when(pl.program_id(0) == pl.program_id(1))
    def _():
        tm, tn = a.shape
        rows = jax.lax.broadcasted_iota(jnp.int32, (tm, tn), 0)
        cols = jax.lax.broadcasted_iota(jnp.int32, (tm, tn), 1)
        eye = (rows == cols).astype(jnp.float32)
        lp_ref[...] = il_r * (a + eye) * il_c
        hp_ref[...] = eye - (ih_r * ((m - a) + eye) * ih_c) * m * alpha


# ------------------------------ wrappers ----------------------------------- #

def node_scores(features, w1, b1, wsum):
    n, d = features.shape
    h = w1.shape[1]
    dp = _round_up(d, 128)       # lane-dense MXU operands (zero-padded)
    hp = _round_up(h, 128)
    if n <= 512:
        tm = _round_up(n, 8)
        n_rows = tm
    else:
        tm = 512
        n_rows = _round_up(n, tm)

    x = _pad2(features, (n_rows, dp))
    w1p = _pad2(w1, (dp, hp))
    b1p = _pad2(b1, (1, hp))
    wsp = _pad2(wsum, (hp, 1))

    s = pl.pallas_call(
        node_score_kernel,
        out_shape=jax.ShapeDtypeStruct((n_rows, 1), jnp.float32),
        grid=(n_rows // tm,),
        in_specs=[pl.BlockSpec((tm, dp), lambda i: (i, 0)),
                  pl.BlockSpec((dp, hp), lambda i: (0, 0)),
                  pl.BlockSpec((1, hp), lambda i: (0, 0)),
                  pl.BlockSpec((hp, 1), lambda i: (0, 0))],
        out_specs=pl.BlockSpec((tm, 1), lambda i: (i, 0)),
        compiler_params=pltpu.CompilerParams(
            dimension_semantics=("parallel",)),
    )(x, w1p, b1p, wsp)
    return s[:n, 0]


def edge_gate(s_u, s_v, noise, temperature):
    e = s_u.shape[1]
    if e <= 8192:
        te = _round_up(e, 128)
        ep = te
    else:
        te = 8192
        ep = _round_up(e, te)

    def padc(x):
        return x if x.shape[1] == ep else _pad2(x, (1, ep))

    kern = functools.partial(edge_gate_kernel, inv_temp=1.0 / float(temperature))
    lp = pl.pallas_call(
        kern,
        out_shape=jax.ShapeDtypeStruct((1, ep), jnp.float32),
        grid=(ep // te,),
        in_specs=[pl.BlockSpec((1, te), lambda i: (0, i))] * 3,
        out_specs=pl.BlockSpec((1, te), lambda i: (0, i)),
        compiler_params=pltpu.CompilerParams(
            dimension_semantics=("parallel",)),
    )(padc(s_u), padc(s_v), padc(noise))
    return lp[0, :e]


def scatter_and_degrees(edge_u, edge_v, weights_lp, n_pad, vmem_limit):
    tm = min(n_pad, 128)
    gi = n_pad // tm

    # glue: bucket edges by destination row tile (data-dependent indices)
    order = jnp.argsort(edge_u)
    u_s = edge_u[order].astype(jnp.int32)
    v_s = edge_v[order].astype(jnp.int32)
    w_s = weights_lp[order].astype(jnp.float32)
    bounds = jnp.arange(gi + 1, dtype=jnp.int32) * tm
    starts = jnp.searchsorted(u_s, bounds).astype(jnp.int32)

    smem_spec = pl.BlockSpec(memory_space=pltpu.MemorySpace.SMEM)
    return pl.pallas_call(
        scatter_degree_kernel,
        out_shape=(jax.ShapeDtypeStruct((n_pad, n_pad), jnp.float32),
                   jax.ShapeDtypeStruct((n_pad, n_pad), jnp.int8),
                   jax.ShapeDtypeStruct((n_pad, 1), jnp.float32),
                   jax.ShapeDtypeStruct((n_pad, 1), jnp.float32)),
        grid=(gi,),
        in_specs=[smem_spec, smem_spec, smem_spec, smem_spec],
        out_specs=(pl.BlockSpec((tm, n_pad), lambda i: (i, 0)),
                   pl.BlockSpec((tm, n_pad), lambda i: (i, 0)),
                   pl.BlockSpec((tm, 1), lambda i: (i, 0)),
                   pl.BlockSpec((tm, 1), lambda i: (i, 0))),
        scratch_shapes=[pltpu.VMEM((tm, n_pad), jnp.float32)],
        compiler_params=pltpu.CompilerParams(
            dimension_semantics=("parallel",),
            vmem_limit_bytes=vmem_limit),
    )(starts, u_s, v_s, w_s)


def adj_normalize(adj_raw, mask_i8, inv_lp, inv_hp, alpha, n, n_pad, tile,
                  vmem_limit):
    gi = n_pad // tile
    kern = functools.partial(adj_norm_kernel, alpha=float(alpha))
    adj_lp, adj_hp = pl.pallas_call(
        kern,
        out_shape=(jax.ShapeDtypeStruct((n_pad, n_pad), jnp.float32),
                   jax.ShapeDtypeStruct((n_pad, n_pad), jnp.float32)),
        grid=(gi, gi),
        in_specs=[pl.BlockSpec((tile, tile), lambda i, j: (i, j)),
                  pl.BlockSpec((tile, tile), lambda i, j: (i, j)),
                  pl.BlockSpec((tile, 1), lambda i, j: (i, 0)),
                  pl.BlockSpec((1, tile), lambda i, j: (0, j)),
                  pl.BlockSpec((tile, 1), lambda i, j: (i, 0)),
                  pl.BlockSpec((1, tile), lambda i, j: (0, j))],
        out_specs=(pl.BlockSpec((tile, tile), lambda i, j: (i, j)),
                   pl.BlockSpec((tile, tile), lambda i, j: (i, j))),
        compiler_params=pltpu.CompilerParams(
            dimension_semantics=("parallel", "parallel"),
            vmem_limit_bytes=vmem_limit),
    )(adj_raw, mask_i8, inv_lp, inv_lp.reshape(1, n_pad),
      inv_hp, inv_hp.reshape(1, n_pad))
    return adj_lp[:n, :n], adj_hp[:n, :n]


def edge_discriminator_forward(features, edges, params, rng_key, *,
                               nnodes, alpha, temperature=1.0,
                               gumbel_bias=0.0 + 0.0001):
    w1, b1, w2, b2 = params["w1"], params["b1"], params["w2"], params["b2"]
    hidden = w1.shape[1]
    num_edges = edges.shape[1]
    cap, vmem_limit = _device_tuning()

    # 1) per-node scalar scores (w2 folded: raw_edge = 0.5*(s_u + s_v))
    wsum = (w2[0, :hidden] + w2[0, hidden:]).reshape(hidden, 1)
    s = node_scores(features, w1, b1, wsum) + b2[0, 0]               # (n,)

    # glue: O(E) endpoint gather + gumbel logit noise (torch.rand analogue)
    s_u = s[edges[0]].reshape(1, num_edges)
    s_v = s[edges[1]].reshape(1, num_edges)
    rand = jax.random.uniform(rng_key, (1, num_edges), dtype=jnp.float32)
    eps = (gumbel_bias - (1.0 - gumbel_bias)) * rand + (1.0 - gumbel_bias)
    noise = jnp.log(eps) - jnp.log(1.0 - eps)

    # 2) edge gate + gumbel sampling (Pallas, lane-dense over edges)
    weights_lp = edge_gate(s_u, s_v, noise, temperature)
    weights_hp = 1.0 - weights_lp

    # 3) Pallas dense scatter + fused row degrees (int8 mask, f32 adjacency)
    n_pad, tile = _adj_tiling(nnodes, cap)
    adj_raw, mask_i8, inv_lp, inv_hp = scatter_and_degrees(
        edges[0], edges[1], weights_lp, n_pad, vmem_limit)

    # 4) symmetric normalization + high-pass filter (elementwise, tiled)
    adj_lp, adj_hp = adj_normalize(adj_raw, mask_i8, inv_lp, inv_hp, alpha,
                                   nnodes, n_pad, tile, vmem_limit)
    return adj_lp, adj_hp, weights_lp, weights_hp


# --------------------------- pure-JAX reference ----------------------------- #

def reference_forward(features, edges, params, rng_key, *,
                      nnodes, alpha, temperature, gumbel_bias):
    hp = jax.lax.Precision.HIGHEST
    emb = jax.nn.relu(jnp.dot(features, params["w1"], precision=hp)
                      + params["b1"])
    eu, ev = emb[edges[0]], emb[edges[1]]
    w2, b2 = params["w2"][0], params["b2"][0, 0]
    s1 = jnp.dot(jnp.concatenate([eu, ev], axis=1), w2, precision=hp) + b2
    s2 = jnp.dot(jnp.concatenate([ev, eu], axis=1), w2, precision=hp) + b2
    raw = 0.5 * (s1 + s2)
    rand = jax.random.uniform(rng_key, (1, edges.shape[1]), dtype=jnp.float32)[0]
    eps = (gumbel_bias - (1.0 - gumbel_bias)) * rand + (1.0 - gumbel_bias)
    gate = (jnp.log(eps) - jnp.log(1.0 - eps) + raw) / temperature
    w_lp = jax.nn.sigmoid(gate)
    w_hp = 1.0 - w_lp
    zeros = jnp.zeros((nnodes, nnodes), jnp.float32)
    eye = jnp.eye(nnodes, dtype=jnp.float32)
    a_lp = zeros.at[edges[0], edges[1]].set(w_lp) + eye
    a_hp = zeros.at[edges[0], edges[1]].set(w_hp) + eye
    mask = zeros.at[edges[0], edges[1]].set(1.0)

    def sym(a):
        inv = 1.0 / (jnp.sqrt(a.sum(axis=1)) + EOS)
        return inv[:, None] * a * inv[None, :]

    return sym(a_lp), eye - sym(a_hp) * mask * alpha, w_lp, w_hp


# ------------------------------- driver ------------------------------------ #

if __name__ == "__main__":
    key = jax.random.PRNGKey(0)
    k_feat, k_edge, k_w1, k_b1, k_w2, k_b2, k_gumbel = jax.random.split(key, 7)

    nnodes = 16
    input_dim = 32
    hidden_dim = 32
    num_edges = 48
    alpha = 0.5
    temperature = 1.0

    features = jax.random.normal(k_feat, (nnodes, input_dim), dtype=jnp.float32)
    # unique (u, v) pairs so scatter / degree semantics are unambiguous
    flat = jax.random.permutation(k_edge, nnodes * nnodes)[:num_edges]
    edges = jnp.stack([flat // nnodes, flat % nnodes]).astype(jnp.int32)

    bound1 = 1.0 / (input_dim ** 0.5)
    bound2 = 1.0 / ((2 * hidden_dim) ** 0.5)
    params = {
        "w1": jax.random.uniform(k_w1, (input_dim, hidden_dim), jnp.float32,
                                 -bound1, bound1),
        "b1": jax.random.uniform(k_b1, (1, hidden_dim), jnp.float32,
                                 -bound1, bound1),
        "w2": jax.random.uniform(k_w2, (1, 2 * hidden_dim), jnp.float32,
                                 -bound2, bound2),
        "b2": jax.random.uniform(k_b2, (1, 1), jnp.float32, -bound2, bound2),
    }

    adj_lp, adj_hp, w_lp, w_hp = edge_discriminator_forward(
        features, edges, params, k_gumbel,
        nnodes=nnodes, alpha=alpha, temperature=temperature)
    jax.block_until_ready((adj_lp, adj_hp, w_lp, w_hp))

    assert adj_lp.shape == (nnodes, nnodes)
    assert adj_hp.shape == (nnodes, nnodes)
    assert w_lp.shape == (num_edges,) and w_hp.shape == (num_edges,)

    r_lp, r_hp, r_wlp, r_whp = reference_forward(
        features, edges, params, k_gumbel,
        nnodes=nnodes, alpha=alpha, temperature=temperature,
        gumbel_bias=0.0001)
    assert jnp.allclose(w_lp, r_wlp, atol=2e-3, rtol=2e-3)
    assert jnp.allclose(w_hp, r_whp, atol=2e-3, rtol=2e-3)
    assert jnp.allclose(adj_lp, r_lp, atol=2e-3, rtol=2e-3)
    assert jnp.allclose(adj_hp, r_hp, atol=2e-3, rtol=2e-3)

    print("KERNEL_OK")
</pallas_src>

<mosaic_0001>
module attributes {stable_mosaic.version = 11 : i64} {
  func.func @node_score_kernel(%arg0: i32, %arg1: memref<16x128xf32, #tpu.memory_space<vmem>>, %arg2: memref<128x128xf32, #tpu.memory_space<vmem>>, %arg3: memref<1x128xf32, #tpu.memory_space<vmem>>, %arg4: memref<128x1xf32, #tpu.memory_space<vmem>>, %arg5: memref<16x1xf32, #tpu.memory_space<vmem>>) attributes {dimension_semantics = [#tpu.dimension_semantics<parallel>], iteration_bounds = array<i64: 1>, scalar_prefetch = 0 : i64, scratch_operands = 0 : i64, tpu.core_type = #tpu.core_type<tc>, window_params = [{transform_indices = @transform_0, window_bounds = array<i64: 16, 128>}, {pipeline_mode = #tpu.pipeline_mode<synchronous>, transform_indices = @transform_1, window_bounds = array<i64: 128, 128>}, {pipeline_mode = #tpu.pipeline_mode<synchronous>, transform_indices = @transform_2, window_bounds = array<i64: 1, 128>}, {pipeline_mode = #tpu.pipeline_mode<synchronous>, transform_indices = @transform_3, window_bounds = array<i64: 128, 1>}, {transform_indices = @transform_4, window_bounds = array<i64: 16, 1>}]} {
    %c0 = arith.constant 0 : index
    %c0_0 = arith.constant 0 : index
    %0 = vector.load %arg1[%c0, %c0_0] : memref<16x128xf32, #tpu.memory_space<vmem>>, vector<16x128xf32>
    %c0_1 = arith.constant 0 : index
    %c0_2 = arith.constant 0 : index
    %1 = vector.load %arg2[%c0_1, %c0_2] : memref<128x128xf32, #tpu.memory_space<vmem>>, vector<128x128xf32>
    %cst = arith.constant dense<0.000000e+00> : vector<16x128xf32>
    %2 = tpu.matmul %0, %1, %cst {dimension_numbers = #tpu.dot_dimension_numbers<[1], [0], [0], [1], [0, 0, 1, 1], [], []>} : vector<16x128xf32>, vector<128x128xf32>, vector<16x128xf32> -> vector<16x128xf32>
    %c0_3 = arith.constant 0 : index
    %c0_4 = arith.constant 0 : index
    %3 = vector.load %arg3[%c0_3, %c0_4] : memref<1x128xf32, #tpu.memory_space<vmem>>, vector<1x128xf32>
    %4 = vector.broadcast %3 : vector<1x128xf32> to vector<16x128xf32>
    %5 = arith.addf %2, %4 : vector<16x128xf32>
    %cst_5 = arith.constant 0.000000e+00 : f32
    %6 = vector.broadcast %cst_5 : f32 to vector<16x128xf32>
    %7 = arith.maximumf %5, %6 : vector<16x128xf32>
    %c0_6 = arith.constant 0 : index
    %c0_7 = arith.constant 0 : index
    %8 = vector.load %arg4[%c0_6, %c0_7] : memref<128x1xf32, #tpu.memory_space<vmem>>, vector<128x1xf32>
    %cst_8 = arith.constant dense<0.000000e+00> : vector<16x1xf32>
    %9 = tpu.matmul %7, %8, %cst_8 {dimension_numbers = #tpu.dot_dimension_numbers<[1], [0], [0], [1], [0, 0, 1, 1], [], []>} : vector<16x128xf32>, vector<128x1xf32>, vector<16x1xf32> -> vector<16x1xf32>
    %c0_9 = arith.constant 0 : index
    %c0_10 = arith.constant 0 : index
    %10 = vector.load %arg5[%c0_9, %c0_10] : memref<16x1xf32, #tpu.memory_space<vmem>>, vector<16x1xf32>
    tpu.vector_store %arg5[%c0_9, %c0_10], %9 {strides = array<i32>} : memref<16x1xf32, #tpu.memory_space<vmem>>, vector<16x1xf32>,
    return
  }
  func.func @transform_0(%arg0: i32) -> (i32, i32) {
    %c0_i32 = arith.constant 0 : i32
    %c0_i32_0 = arith.constant 0 : i32
    return %arg0, %c0_i32 : i32, i32
  }
  func.func @transform_1(%arg0: i32) -> (i32, i32) {
    %c0_i32 = arith.constant 0 : i32
    %c0_i32_0 = arith.constant 0 : i32
    %c0_i32_1 = arith.constant 0 : i32
    return %c0_i32, %c0_i32_0 : i32, i32
  }
  func.func @transform_2(%arg0: i32) -> (i32, i32) {
    %c0_i32 = arith.constant 0 : i32
    %c0_i32_0 = arith.constant 0 : i32
    %c0_i32_1 = arith.constant 0 : i32
    return %c0_i32, %c0_i32_0 : i32, i32
  }
  func.func @transform_3(%arg0: i32) -> (i32, i32) {
    %c0_i32 = arith.constant 0 : i32
    %c0_i32_0 = arith.constant 0 : i32
    %c0_i32_1 = arith.constant 0 : i32
    return %c0_i32, %c0_i32_0 : i32, i32
  }
  func.func @transform_4(%arg0: i32) -> (i32, i32) {
    %c0_i32 = arith.constant 0 : i32
    %c0_i32_0 = arith.constant 0 : i32
    return %arg0, %c0_i32 : i32, i32
  }
}

</mosaic_0001>

<bundles_post_ra>
// kernel: tpu_custom_call.1
= control target key start
LH: loop header
LB: loop body
LE: loop exit
PB: predicated region body
PF: predicated region fallthrough
CT: control target
= control target key end

     0   :  { %9 = vsyncpa [#allocation3], 0  ;;  %s430_s15 = smov [#allocation2]   ;;  %s575_s0 = inlined_call_operand.hbm [shape: f32[16,128], index: 0, kind: input, shape index: {}]   ;;  %s576_s1 = inlined_call_operand.vmem [shape: f32[128,128], index: 1, kind: input, shape index: {}]   ;;  %s577_s2 = inlined_call_operand.vmem [shape: f32[1,128], index: 2, kind: input, shape index: {}]   ;;  %s578_s3 = inlined_call_operand.vmem [shape: f32[128,1], index: 3, kind: input, shape index: {}]   ;;  %s579_s4 = inlined_call_operand.vmem [shape: f32[16,1], index: 4, kind: output, shape index: {}]  }
   0x1   :  { %s15_s16 = sshll.u32 %s430_s15, 4  ;;  %s406_s19 = scalar_lea.hbm %s575_s0, 256  ;;  %s16_s16 = int_to_ptr.vmem [resolvable:$true] %s15_s16 }
   0x2   :  { %p407_p0 = scmp.ne.s32.totalorder %s575_s0, %s406_s19  ;;  %p410_p1 = scmp.lt.u32.totalorder %s406_s19, %s575_s0 }
   0x4   :  { %p412_p2 = pnand %p410_p1, %p407_p0 }
   0x6   :  { %415 = shalt.err (!%p412_p2)
}
   0x7   :  { %s416_s24 = scalar_lea.vmem %s16_s16, 256  ;;  %p421_p4 = scmp.lt.s32.totalorder %s16_s16, %s16_s16 }
   0x8   :  { %p417_p3 = scmp.ne.s32.totalorder %s16_s16, %s416_s24  ;;  %p422_p5 = scmp.lt.s32.totalorder %s416_s24, %s416_s24 }
   0xa   :  { %p423_p6 = por %p422_p5, %p421_p4 }
   0xc   :  { %p424_p7 = pnand %p423_p6, %p417_p3 }
   0xe   :  { %427 = shalt.err (!%p424_p7)
}
   0xf   :  { %s431_s25 = smov 128   ;;  %s432_s26 = smov 8  }
  0x10   :  { %21 = dma.hbm_to_vmem [thread:$0]  %s575_s0, 256, %s16_s16, [#allocation3], %s431_s25, %s431_s25, %s432_s26  }
  0x11   :  { %428 = dma.done.wait [#allocation3], 256  }
  0x12   :  { %429 = vsyncadd [#allocation3], 4294967040  ;;  %v33_v0 = vld [vmem:[%s576_s1] sm:$0xff]  ;;  %v34_v1 = vld [vmem:[%s576_s1 + $0x8] sm:$0xff]  ;;  %vm224_vm0 = vcmask 7168  }
  0x13   :  { %v35_v2 = vld [vmem:[%s576_s1 + $0x10] sm:$0xff]  ;;  %v339_v3 = vpack.c.bf16 %v34_v1, %v33_v0  ;;  %v36_v4 = vld [vmem:[%s576_s1 + $0x18] sm:$0xff]  ;;  %v37_v6 = vld [vmem:[%s576_s1 + $0x20] sm:$0xff] }
  0x14   :  { %v343_v5 = vpack.c.bf16 %v36_v4, %v35_v2  ;;  %v38_v7 = vld [vmem:[%s576_s1 + $0x28] sm:$0xff]  ;;  %v39_v9 = vld [vmem:[%s576_s1 + $0x30] sm:$0xff]  ;;  %v40_v10 = vld [vmem:[%s576_s1 + $0x38] sm:$0xff] }
  0x15   :  { %340 = vmatprep.subr.bf16.mxu0 %v339_v3  ;;  %v347_v8 = vpack.c.bf16 %v38_v7, %v37_v6  ;;  %v31_v11 = vld [vmem:[#allocation2] sm:$0xff]  ;;  %v134_v13 = vld [vmem:[%s578_s3 + $0x8] sm:$0xff]  ;;  %v135_v14 = vld [vmem:[%s578_s3 + $0x10] sm:$0xff]  ;;  %v351_v20 = vpack.c.bf16 %v40_v10, %v39_v9 }
  0x16   :  { %342 = vmatpush3.bf16.msra.mxu0 %v339_v3  ;;  %301 = vmatprep.mubr.f32.mxu0 %v31_v11  ;;  %v133_v12 = vld [vmem:[%s578_s3] sm:$0xff]  ;;  %v136_v16 = vld [vmem:[%s578_s3 + $0x18] sm:$0xff]  ;;  %v138_v19 = vld [vmem:[%s578_s3 + $0x28] sm:$0xff] }
  0x17   :  { %344 = vmatprep.subr.bf16.mxu0 %v343_v5  ;;  %v371_v15 = vpack.c.bf16 %v134_v13, %v133_v12  ;;  %v375_v17 = vpack.c.bf16 %v136_v16, %v135_v14  ;;  %v137_v18 = vld [vmem:[%s578_s3 + $0x20] sm:$0xff]  ;;  %v42_v22 = vld [vmem:[%s576_s1 + $0x48] sm:$0xff]  ;;  %v139_v24 = vld [vmem:[%s578_s3 + $0x30] sm:$0xff] }
  0x18   :  { %v41_v21 = vld [vmem:[%s576_s1 + $0x40] sm:$0xff]  ;;  %v379_v23 = vpack.c.bf16 %v138_v19, %v137_v18  ;;  %v140_v25 = vld [vmem:[%s578_s3 + $0x38] sm:$0xff]  ;;  %v43_v27 = vld [vmem:[%s576_s1 + $0x50] sm:$0xff] }
  0x19   :  { %372 = vmatprep.subr.bf16.mxu1 %v371_v15  ;;  %v355_v26 = vpack.c.bf16 %v42_v22, %v41_v21  ;;  %v44_v28 = vld [vmem:[%s576_s1 + $0x58] sm:$0xff]  ;;  %v383_v29 = vpack.c.bf16 %v140_v25, %v139_v24  ;;  %v141_v30 = vld [vmem:[%s578_s3 + $0x40] sm:$0xff]  ;;  %v142_v31 = vld [vmem:[%s578_s3 + $0x48] sm:$0xff] }
  0x1a   :  { %346 = vmatpush3.bf16.msra.mxu0 %v343_v5  ;;  %374 = vmatpush3.bf16.msra.mxu1 %v371_v15  ;;  %v359_v32 = vpack.c.bf16 %v44_v28, %v43_v27  ;;  %v45_v33 = vld [vmem:[%s576_s1 + $0x60] sm:$0xff]  ;;  %v46_v34 = vld [vmem:[%s576_s1 + $0x68] sm:$0xff]  ;;  %v387_v35 = vpack.c.bf16 %v142_v31, %v141_v30  ;;  %v143_v36 = vld [vmem:[%s578_s3 + $0x50] sm:$0xff] }
  0x1b   :  { %348 = vmatprep.subr.bf16.mxu0 %v347_v8  ;;  %376 = vmatprep.subr.bf16.mxu1 %v375_v17  ;;  %v144_v37 = vld [vmem:[%s578_s3 + $0x58] sm:$0xff]  ;;  %v363_v38 = vpack.c.bf16 %v46_v34, %v45_v33  ;;  %v47_v39 = vld [vmem:[%s576_s1 + $0x70] sm:$0xff]  ;;  %v145_v42 = vld [vmem:[%s578_s3 + $0x60] sm:$0xff] }
  0x1c   :  { %v48_v40 = vld [vmem:[%s576_s1 + $0x78] sm:$0xff]  ;;  %v391_v41 = vpack.c.bf16 %v144_v37, %v143_v36  ;;  %v146_v43 = vld [vmem:[%s578_s3 + $0x68] sm:$0xff]  ;;  %v147_v47 = vld [vmem:[%s578_s3 + $0x70] sm:$0xff] }
  0x1d   :  { %v367_v44 = vpack.c.bf16 %v48_v40, %v47_v39  ;;  %v395_v45 = vpack.c.bf16 %v146_v43, %v145_v42  ;;  %v32_v46 = vld [vmem:[#allocation2 + $0x8] sm:$0xff]  ;;  %v148_v48 = vld [vmem:[%s578_s3 + $0x78] sm:$0xff]  ;;  %v232_v50 = vld [vmem:[%s577_s2] ss:$0 sm:$0xff] }
  0x1e   :  { %350 = vmatpush3.bf16.msra.mxu0 %v347_v8  ;;  %378 = vmatpush3.bf16.msra.mxu1 %v375_v17  ;;  %v399_v49 = vpack.c.bf16 %v148_v48, %v147_v47 }
  0x1f   :  { %352 = vmatprep.subr.bf16.mxu0 %v351_v20  ;;  %380 = vmatprep.subr.bf16.mxu1 %v379_v23 }
  0x22   :  { %354 = vmatpush3.bf16.msra.mxu0 %v351_v20  ;;  %382 = vmatpush3.bf16.msra.mxu1 %v379_v23 }
  0x23   :  { %356 = vmatprep.subr.bf16.mxu0 %v355_v26  ;;  %384 = vmatprep.subr.bf16.mxu1 %v383_v29 }
  0x26   :  { %358 = vmatpush3.bf16.msra.mxu0 %v355_v26  ;;  %386 = vmatpush3.bf16.msra.mxu1 %v383_v29 }
  0x27   :  { %360 = vmatprep.subr.bf16.mxu0 %v359_v32  ;;  %388 = vmatprep.subr.bf16.mxu1 %v387_v35 }
  0x2a   :  { %362 = vmatpush3.bf16.msra.mxu0 %v359_v32  ;;  %390 = vmatpush3.bf16.msra.mxu1 %v387_v35 }
  0x2b   :  { %364 = vmatprep.subr.bf16.mxu0 %v363_v38  ;;  %392 = vmatprep.subr.bf16.mxu1 %v391_v41 }
  0x2e   :  { %366 = vmatpush3.bf16.msra.mxu0 %v363_v38  ;;  %394 = vmatpush3.bf16.msra.mxu1 %v391_v41 }
  0x2f   :  { %368 = vmatprep.subr.bf16.mxu0 %v367_v44  ;;  %396 = vmatprep.subr.bf16.mxu1 %v395_v45 }
  0x32   :  { %370 = vmatpush3.bf16.msra.mxu0 %v367_v44  ;;  %398 = vmatpush3.bf16.msra.mxu1 %v395_v45 }
  0x33   :  { %400 = vmatprep.subr.bf16.mxu1 %v399_v49 }
  0x35   :  { %302 = vmatmul.mubr.f32.vlgmr.msra.gmra.mrb[0].mxu0 %v32_v46 }
  0x36   :  { %402 = vmatpush3.bf16.msra.mxu1 %v399_v49 }
 0x108   :  { %v303_v51 = vpop.f32.mrb[0].mxu0 }
 0x109   :  { %v128_v52 = vadd.f32 %v303_v51, %v232_v50  ;;  %v122_v53 = vpop.f32.mrb[1].mxu0 }
 0x10a   :  { %v123_v54 = vadd.f32 %v232_v50, %v122_v53 }
 0x10b   :  { %v132_v56 = vmax.f32 %v128_v52, 0.0 }
 0x10c   :  { %v131_v55 = vmax.f32 %v123_v54, 0.0 }
 0x10e   :  { %336 = vmatprep.mubr.f32.mxu1 %v131_v55 }
 0x10f   :  { %337 = vmatmul.mubr.f32.vlgmr.msra.gmra.mrb[0].mxu1 %v132_v56 }
 0x1e2   :  { %v338_v57 = vpop.f32.mrb[0].mxu1 }
 0x1e3   :  { %226 = vst.msk [vmem:[%s579_s4 + $0x8] sm:$0xff] %vm224_vm0, %v338_v57  ;;  %v215_v58 = vpop.f32.mrb[1].mxu1 }
 0x1e4   :  { %225 = vst.msk [vmem:[%s579_s4] sm:$0xff] %vm224_vm0, %v215_v58 }
 0x1e5   :  { %231 = vsyncpa [#allocation3], 1 }

</bundles_post_ra>
